<compile_context>
chip_gen: v6e
topology: v6e:2x2x1
jax: 0.10.0
libtpu: 0.0.40
codegen_flags: <defaults>
</compile_context>

<pallas_src>
import functools

import jax
import jax.numpy as jnp
from jax.experimental import pallas as pl
from jax.experimental.pallas import tpu as pltpu


# ---------------------------------------------------------------------------
# Kernels
# ---------------------------------------------------------------------------

def _channel_exchange_kernel(x1_ref, x2_ref, o1_ref, o2_ref, *, p: int, C: int):
    """General path: one (TM, THW) tile of the (N*C, H*W) view of both inputs."""
    tm = x1_ref.shape[0]
    # Global row index of every sublane in this tile -> channel -> exchange bit.
    # Shape (TM, 1); broadcast across lanes inside jnp.where.
    row = pl.program_id(0) * tm + jax.lax.broadcasted_iota(jnp.int32, (tm, 1), 0)
    exchange = ((row % C) % p) == 0

    x1 = x1_ref[...]
    x2 = x2_ref[...]
    # One vsel per data vreg, no scratch staging (v5e: single store slot).
    o1_ref[...] = jnp.where(exchange, x2, x1)
    o2_ref[...] = jnp.where(exchange, x1, x2)


def _exchange_only_kernel(x1_ref, x2_ref, o1_ref, o2_ref):
    """Donate fast path: only the exchanged channels are copied (crosswise);
    pass-through channels live in the aliased output buffers untouched."""
    o1_ref[...] = x2_ref[...]
    o2_ref[...] = x1_ref[...]


# ---------------------------------------------------------------------------
# Tiling / VMEM helpers
# ---------------------------------------------------------------------------

def _sublane_pack(dtype) -> int:
    """Minimum legal sublane block: 8 for f32, 16 for bf16, 32 for int8."""
    itemsize = jnp.dtype(dtype).itemsize
    return 8 * max(1, 4 // itemsize)


def _vmem_capacity_bytes() -> int:
    """Physical VMEM per core; conservative (v7x = 64 MiB) if unknown."""
    try:
        info = pltpu.get_tpu_info()
        cap = getattr(info, "vmem_capacity_bytes", None)
        if cap:
            return int(cap)
    except Exception:
        pass
    return 64 << 20


def _vmem_limit(tile_bytes: int, capacity: int) -> int:
    """4 arrays x 2 pipeline buffers = 8 tiles, +2 tiles of Mosaic headroom.
    Clamped generation-aware to 90% of physical VMEM."""
    return int(min(max(10 * tile_bytes, 32 << 20), int(capacity * 0.9)))


def _divisors(n: int):
    ds, i = set(), 1
    while i * i <= n:
        if n % i == 0:
            ds.add(i)
            ds.add(n // i)
        i += 1
    return sorted(ds)


def _choose_tiles(rows: int, lanes: int, itemsize: int, pack: int,
                  tile_cap: int) -> tuple[int, int]:
    """Pick (row_tile, lane_tile) for a (rows, lanes) stream.

    lane tile: largest 128-multiple divisor of `lanes` that keeps even the
      minimum-height row block under the cap; full extent for ragged lanes.
    row tile: largest multiple of the sublane packing that divides `rows` and
      keeps the per-array tile under the cap, preferring a grid of >= 2 steps
      (v7x has two TensorCores).
    """
    # ---- lane tile ----
    if lanes % 128 == 0:
        thw = 128
        for cand in (8192, 4096, 2048, 1024, 512, 256, 128):
            if lanes % cand == 0 and pack * cand * itemsize <= tile_cap:
                thw = cand
                break
    else:
        # Full-extent lane block is always legal; only the tail vreg per row
        # is partially masked and that is hidden behind HBM bandwidth.
        thw = lanes
    n_hw = lanes // thw

    # ---- row tile ----
    if rows % pack != 0:
        # Rare (N*C not a multiple of the dtype packing): full-extent rows.
        # TODO(synk): pad the row dimension if rows*thw ever overflows VMEM.
        return rows, thw

    cands = sorted((d for d in _divisors(rows) if d % pack == 0), reverse=True)
    fitting = [d for d in cands if d * thw * itemsize <= tile_cap] or [pack]
    tm = fitting[0]
    # Keep at least 2 grid steps when there is anything to split (v7x megacore).
    if (rows // tm) * n_hw < 2:
        for d in fitting:
            if (rows // d) * n_hw >= 2:
                tm = d
                break
    return tm, thw


# ---------------------------------------------------------------------------
# Wrapper
# ---------------------------------------------------------------------------

def channel_exchange(x1: jax.Array, x2: jax.Array, p: int = 2,
                     donate_inputs: bool = False):
    """Pallas implementation of ChannelExchange.forward.

    Args:
      x1, x2: arrays of shape (N, C, H, W), same shape and dtype.
      p: exchange period (channels with index % p == 0 are swapped), >= 1.
      donate_inputs: alias x1/x2 to the outputs.  When C % p == 0 and H*W is a
        multiple of 128 this also enables the exchanged-channels-only copy
        (~p x less HBM traffic).  Callers must donate x1/x2 at the jit
        boundary and must not reuse them afterwards.

    Returns:
      (out_x1, out_x2) with the same shape/dtype as the inputs.
    """
    assert x1.shape == x2.shape and x1.dtype == x2.dtype
    assert p >= 1, "exchange period p must be >= 1"
    N, C, H, W = x1.shape
    HW = H * W

    itemsize = jnp.dtype(x1.dtype).itemsize
    pack = _sublane_pack(x1.dtype)
    capacity = _vmem_capacity_bytes()
    total_budget = min(int(capacity * 0.65), 96 << 20)      # v7x ~41 MiB, v5e/v6e ~83 MiB
    tile_cap = min(4 << 20, max(total_budget // 10, 512 << 10))

    # ---------------- donate fast path: move only exchanged channels --------
    if donate_inputs and C % p == 0 and HW % 128 == 0:
        # (N, C, HW) -> (N*(C//p), p*HW): each row holds p consecutive
        # channels; the exchanged channel (c % p == 0) is the first HW lanes.
        R = N * (C // p)
        x1r = x1.reshape(R, p * HW)
        x2r = x2.reshape(R, p * HW)
        tm, thw = _choose_tiles(R, HW, itemsize, pack, tile_cap)
        grid = (R // tm, HW // thw)      # lane grid only covers the exchanged slice
        blk = pl.BlockSpec((tm, thw), lambda i, j: (i, j))
        out_sds = jax.ShapeDtypeStruct((R, p * HW), x1.dtype)

        o1r, o2r = pl.pallas_call(
            _exchange_only_kernel,
            grid=grid,
            in_specs=[blk, blk],
            out_specs=[blk, blk],
            out_shape=(out_sds, out_sds),
            input_output_aliases={0: 0, 1: 1},
            compiler_params=pltpu.CompilerParams(
                dimension_semantics=("parallel", "parallel"),
                vmem_limit_bytes=_vmem_limit(tm * thw * itemsize, capacity),
            ),
        )(x1r, x2r)
        return o1r.reshape(N, C, H, W), o2r.reshape(N, C, H, W)

    # ---------------- general path: full crosswise select --------------------
    R = N * C
    x1f = x1.reshape(R, HW)
    x2f = x2.reshape(R, HW)
    tm, thw = _choose_tiles(R, HW, itemsize, pack, tile_cap)
    grid = (R // tm, HW // thw)
    blk = pl.BlockSpec((tm, thw), lambda i, j: (i, j))
    out_sds = jax.ShapeDtypeStruct((R, HW), x1.dtype)

    kernel = functools.partial(_channel_exchange_kernel, p=p, C=C)
    o1f, o2f = pl.pallas_call(
        kernel,
        grid=grid,
        in_specs=[blk, blk],
        out_specs=[blk, blk],
        out_shape=(out_sds, out_sds),
        input_output_aliases={0: 0, 1: 1} if donate_inputs else {},
        compiler_params=pltpu.CompilerParams(
            dimension_semantics=("parallel", "parallel"),
            vmem_limit_bytes=_vmem_limit(tm * thw * itemsize, capacity),
        ),
    )(x1f, x2f)
    return o1f.reshape(N, C, H, W), o2f.reshape(N, C, H, W)


def _reference_channel_exchange(x1, x2, p=2):
    """Pure-JAX reference mirroring the PyTorch module."""
    N, C, H, W = x1.shape
    mask = (jnp.arange(C) % p == 0)[None, :, None, None]
    out1 = jnp.where(mask, x2, x1)
    out2 = jnp.where(mask, x1, x2)
    return out1, out2


if __name__ == "__main__":
    key = jax.random.PRNGKey(0)
    k1, k2, k3, k4, k5, k6 = jax.random.split(key, 6)

    # Main case: lane-dense spatial dims (HW = 256, multiple of 128).
    N, C, H, W = 2, 4, 16, 16
    x1 = jax.random.normal(k1, (N, C, H, W), dtype=jnp.float32)
    x2 = jax.random.normal(k2, (N, C, H, W), dtype=jnp.float32)
    out1, out2 = channel_exchange(x1, x2, p=2)
    jax.block_until_ready(out1)
    jax.block_until_ready(out2)
    ref1, ref2 = _reference_channel_exchange(x1, x2, p=2)
    assert jnp.allclose(out1, ref1), "out_x1 mismatch"
    assert jnp.allclose(out2, ref2), "out_x2 mismatch"

    # Ragged spatial dims (HW = 25) and rows not a packing multiple, p=3.
    y1 = jax.random.normal(k3, (2, 6, 5, 5), dtype=jnp.float32)
    y2 = jax.random.normal(k4, (2, 6, 5, 5), dtype=jnp.float32)
    oy1, oy2 = channel_exchange(y1, y2, p=3)
    jax.block_until_ready(oy1)
    ry1, ry2 = _reference_channel_exchange(y1, y2, p=3)
    assert jnp.allclose(oy1, ry1), "out_x1 mismatch (p=3)"
    assert jnp.allclose(oy2, ry2), "out_x2 mismatch (p=3)"

    # Donate fast path: only exchanged channels are moved; inputs donated at
    # the jit boundary so pass-through channels stay in place (aliased).
    z1 = jax.random.normal(k5, (N, C, H, W), dtype=jnp.float32)
    z2 = jax.random.normal(k6, (N, C, H, W), dtype=jnp.float32)
    rz1, rz2 = _reference_channel_exchange(z1, z2, p=2)
    jax.block_until_ready(rz1)
    donate_fn = jax.jit(
        functools.partial(channel_exchange, p=2, donate_inputs=True),
        donate_argnums=(0, 1),
    )
    oz1, oz2 = donate_fn(z1, z2)
    jax.block_until_ready(oz1)
    assert jnp.allclose(oz1, rz1), "out_x1 mismatch (donate path)"
    assert jnp.allclose(oz2, rz2), "out_x2 mismatch (donate path)"

    print("KERNEL_OK")
</pallas_src>

<mosaic_0001>
module attributes {stable_mosaic.version = 11 : i64} {
  func.func @_channel_exchange_kernel(%arg0: i32, %arg1: i32, %arg2: memref<8x256xf32, #tpu.memory_space<vmem>>, %arg3: memref<8x256xf32, #tpu.memory_space<vmem>>, %arg4: memref<8x256xf32, #tpu.memory_space<vmem>>, %arg5: memref<8x256xf32, #tpu.memory_space<vmem>>) attributes {dimension_semantics = [#tpu.dimension_semantics<parallel>, #tpu.dimension_semantics<parallel>], iteration_bounds = array<i64: 1, 1>, scalar_prefetch = 0 : i64, scratch_operands = 0 : i64, tpu.core_type = #tpu.core_type<tc>, window_params = [{transform_indices = @transform_0, window_bounds = array<i64: 8, 256>}, {transform_indices = @transform_1, window_bounds = array<i64: 8, 256>}, {transform_indices = @transform_2, window_bounds = array<i64: 8, 256>}, {transform_indices = @transform_3, window_bounds = array<i64: 8, 256>}]} {
    %c8_i32 = arith.constant 8 : i32
    %0 = arith.muli %arg0, %c8_i32 : i32
    %1 = tpu.iota {dimensions = array<i32: 0>} : vector<8x1xi32>
    %2 = vector.broadcast %0 : i32 to vector<8x1xi32>
    %3 = arith.addi %2, %1 : vector<8x1xi32>
    %c4_i32 = arith.constant 4 : i32
    %c0_i32 = arith.constant 0 : i32
    %4 = arith.cmpi eq, %c4_i32, %c0_i32 : i32
    %c1_i32 = arith.constant 1 : i32
    %5 = arith.select %4, %c1_i32, %c4_i32 : i32
    %6 = vector.broadcast %5 : i32 to vector<8x1xi32>
    %7 = arith.remsi %3, %6 : vector<8x1xi32>
    %c0_i32_0 = arith.constant 0 : i32
    %8 = vector.broadcast %c0_i32_0 : i32 to vector<8x1xi32>
    %9 = arith.cmpi ne, %7, %8 : vector<8x1xi32>
    %c0_i32_1 = arith.constant 0 : i32
    %10 = vector.broadcast %c0_i32_1 : i32 to vector<8x1xi32>
    %11 = arith.cmpi slt, %7, %10 : vector<8x1xi32>
    %c0_i32_2 = arith.constant 0 : i32
    %12 = arith.cmpi slt, %5, %c0_i32_2 : i32
    %13 = vector.broadcast %12 : i1 to vector<8x1xi1>
    %14 = vector.broadcast %13 : vector<8x1xi1> to vector<8x1xi1>
    %15 = arith.xori %11, %14 : vector<8x1xi1>
    %16 = arith.andi %15, %9 : vector<8x1xi1>
    %17 = vector.broadcast %5 : i32 to vector<8x1xi32>
    %18 = arith.addi %7, %17 : vector<8x1xi32>
    %19 = arith.select %16, %18, %7 : vector<8x1xi1>, vector<8x1xi32>
    %c2_i32 = arith.constant 2 : i32
    %c0_i32_3 = arith.constant 0 : i32
    %20 = arith.cmpi eq, %c2_i32, %c0_i32_3 : i32
    %c1_i32_4 = arith.constant 1 : i32
    %21 = arith.select %20, %c1_i32_4, %c2_i32 : i32
    %22 = vector.broadcast %21 : i32 to vector<8x1xi32>
    %23 = arith.remsi %19, %22 : vector<8x1xi32>
    %c0_i32_5 = arith.constant 0 : i32
    %24 = vector.broadcast %c0_i32_5 : i32 to vector<8x1xi32>
    %25 = arith.cmpi ne, %23, %24 : vector<8x1xi32>
    %c0_i32_6 = arith.constant 0 : i32
    %26 = vector.broadcast %c0_i32_6 : i32 to vector<8x1xi32>
    %27 = arith.cmpi slt, %23, %26 : vector<8x1xi32>
    %c0_i32_7 = arith.constant 0 : i32
    %28 = arith.cmpi slt, %21, %c0_i32_7 : i32
    %29 = vector.broadcast %28 : i1 to vector<8x1xi1>
    %30 = vector.broadcast %29 : vector<8x1xi1> to vector<8x1xi1>
    %31 = arith.xori %27, %30 : vector<8x1xi1>
    %32 = arith.andi %31, %25 : vector<8x1xi1>
    %33 = vector.broadcast %21 : i32 to vector<8x1xi32>
    %34 = arith.addi %23, %33 : vector<8x1xi32>
    %35 = arith.select %32, %34, %23 : vector<8x1xi1>, vector<8x1xi32>
    %c0_i32_8 = arith.constant 0 : i32
    %36 = vector.broadcast %c0_i32_8 : i32 to vector<8x1xi32>
    %37 = arith.cmpi eq, %35, %36 : vector<8x1xi32>
    %c0 = arith.constant 0 : index
    %c0_9 = arith.constant 0 : index
    %38 = vector.load %arg2[%c0, %c0_9] : memref<8x256xf32, #tpu.memory_space<vmem>>, vector<8x256xf32>
    %c0_10 = arith.constant 0 : index
    %c0_11 = arith.constant 0 : index
    %39 = vector.load %arg3[%c0_10, %c0_11] : memref<8x256xf32, #tpu.memory_space<vmem>>, vector<8x256xf32>
    %40 = vector.shape_cast %37 : vector<8x1xi1> to vector<8x1xi1>
    %41 = vector.broadcast %40 : vector<8x1xi1> to vector<8x256xi1>
    %42 = arith.select %41, %39, %38 : vector<8x256xi1>, vector<8x256xf32>
    %c0_12 = arith.constant 0 : index
    %c0_13 = arith.constant 0 : index
    %43 = vector.load %arg4[%c0_12, %c0_13] : memref<8x256xf32, #tpu.memory_space<vmem>>, vector<8x256xf32>
    tpu.vector_store %arg4[%c0_12, %c0_13], %42 {strides = array<i32>} : memref<8x256xf32, #tpu.memory_space<vmem>>, vector<8x256xf32>,
    %44 = vector.shape_cast %37 : vector<8x1xi1> to vector<8x1xi1>
    %45 = vector.broadcast %44 : vector<8x1xi1> to vector<8x256xi1>
    %46 = arith.select %45, %38, %39 : vector<8x256xi1>, vector<8x256xf32>
    %c0_14 = arith.constant 0 : index
    %c0_15 = arith.constant 0 : index
    %47 = vector.load %arg5[%c0_14, %c0_15] : memref<8x256xf32, #tpu.memory_space<vmem>>, vector<8x256xf32>
    tpu.vector_store %arg5[%c0_14, %c0_15], %46 {strides = array<i32>} : memref<8x256xf32, #tpu.memory_space<vmem>>, vector<8x256xf32>,
    return
  }
  func.func @transform_0(%arg0: i32, %arg1: i32) -> (i32, i32) {
    %c0_i32 = arith.constant 0 : i32
    return %arg0, %arg1 : i32, i32
  }
  func.func @transform_1(%arg0: i32, %arg1: i32) -> (i32, i32) {
    %c0_i32 = arith.constant 0 : i32
    return %arg0, %arg1 : i32, i32
  }
  func.func @transform_2(%arg0: i32, %arg1: i32) -> (i32, i32) {
    %c0_i32 = arith.constant 0 : i32
    return %arg0, %arg1 : i32, i32
  }
  func.func @transform_3(%arg0: i32, %arg1: i32) -> (i32, i32) {
    %c0_i32 = arith.constant 0 : i32
    return %arg0, %arg1 : i32, i32
  }
}

</mosaic_0001>

<bundles_post_ra>
// kernel: tpu_custom_call.1
= control target key start
LH: loop header
LB: loop body
LE: loop exit
PB: predicated region body
PF: predicated region fallthrough
CT: control target
= control target key end

     0   :  { %9 = vsyncpa [#allocation3], 0  ;;  %s241_s0 = inlined_call_operand.hbm [shape: f32[8,256], index: 0, kind: input, shape index: {}]   ;;  %s242_s1 = inlined_call_operand.hbm [shape: f32[8,256], index: 1, kind: input, shape index: {}]   ;;  %s243_s2 = inlined_call_operand.hbm [shape: f32[8,256], index: 2, kind: output, shape index: {0}]   ;;  %s244_s3 = inlined_call_operand.hbm [shape: f32[8,256], index: 3, kind: output, shape index: {1}]  }
   0x1   :  { %10 = vsyncpa [#allocation6], 0 }
   0x2   :  { %11 = vsyncpa [#allocation4], 0 }
   0x3   :  { %12 = vsyncpa [#allocation9], 0  ;;  %s205_s12 = smov [#allocation2]   ;;  %s206_s14 = smov [#allocation5]  }
   0x4   :  { %s19_s13 = sshll.u32 %s205_s12, 4  ;;  %s29_s15 = sshll.u32 %s206_s14, 4  ;;  %s20_s13 = int_to_ptr.vmem [resolvable:$true] %s19_s13  ;;  %s30_s15 = int_to_ptr.vmem [resolvable:$true] %s29_s15 }
   0x5   :  { %s125_s16 = scalar_lea.vmem %s20_s13, 256  ;;  %p130_p1 = scmp.lt.s32.totalorder %s20_s13, %s20_s13 }
   0x6   :  { %p126_p0 = scmp.ne.s32.totalorder %s20_s13, %s125_s16  ;;  %p131_p2 = scmp.lt.s32.totalorder %s125_s16, %s125_s16 }
   0x8   :  { %p132_p3 = por %p131_p2, %p130_p1 }
   0xa   :  { %p133_p4 = pnand %p132_p3, %p126_p0 }
   0xc   :  { %136 = shalt.err (!%p133_p4)
}
   0xd   :  { %22 = dma.hbm_to_vmem [thread:$0]  %s241_s0, 256, %s20_s13, [#allocation3]  }
   0xe   :  { %s145_s19 = scalar_lea.vmem %s30_s15, 256  ;;  %p150_p6 = scmp.lt.s32.totalorder %s30_s15, %s30_s15 }
   0xf   :  { %p146_p5 = scmp.ne.s32.totalorder %s30_s15, %s145_s19  ;;  %p151_p7 = scmp.lt.s32.totalorder %s145_s19, %s145_s19 }
  0x11   :  { %p152_p8 = por %p151_p7, %p150_p6 }
  0x13   :  { %p153_p9 = pnand %p152_p8, %p146_p5 }
  0x15   :  { %156 = shalt.err (!%p153_p9)
}
  0x16   :  { %32 = dma.hbm_to_vmem [thread:$0]  %s242_s1, 256, %s30_s15, [#allocation6]  }
  0x17   :  { %197 = dma.done.wait [#allocation3], 256  }
  0x18   :  { %198 = vsyncadd [#allocation3], 4294967040 }
  0x19   :  { %199 = dma.done.wait [#allocation6], 256  }
  0x1a   :  { %200 = vsyncadd [#allocation6], 4294967040  ;;  %v40_v0 = vlaneseq  ;;  %s207_s22 = smov [#allocation7]   ;;  %s208_s23 = smov [#allocation8]   ;;  %v69_v4 = vld [vmem:[#allocation2] sm:$0xff]  ;;  %v71_v5 = vld [vmem:[#allocation5] sm:$0xff] }
  0x1b   :  { %s89_s0 = sshll.u32 %s207_s22, 4  ;;  %s99_s24 = sshll.u32 %s208_s23, 4  ;;  %v70_v6 = vld [vmem:[#allocation2 + $0x8] sm:$0xff]  ;;  %v72_v7 = vld [vmem:[#allocation5 + $0x8] sm:$0xff]  ;;  %s90_s0 = int_to_ptr.vmem [resolvable:$true] %s89_s0  ;;  %s100_s24 = int_to_ptr.vmem [resolvable:$true] %s99_s24 }
  0x1c   :  { %v41_v1 = vshrl.u32 %v40_v0, 7  ;;  %s157_s1 = scalar_lea.vmem %s90_s0, 256  ;;  %p162_p11 = scmp.lt.s32.totalorder %s90_s0, %s90_s0 }
  0x1d   :  { %p158_p10 = scmp.ne.s32.totalorder %s90_s0, %s157_s1  ;;  %p163_p12 = scmp.lt.s32.totalorder %s157_s1, %s157_s1 }
  0x1e   :  { %v48_v2 = vand.u32 3, %v41_v1 }
  0x1f   :  { %p164_p13 = por %p163_p12, %p162_p11 }
  0x20   :  { %v60_v3 = vand.u32 1, %v48_v2 }
  0x21   :  { %p165_p0 = pnand %p164_p13, %p158_p10 }
  0x22   :  { %vm68_vm0 = vcmp.eq.s32.totalorder %v60_v3, 0 }
  0x23   :  { %v75_v8 = vsel %vm68_vm0, %v71_v5, %v69_v4  ;;  %v76_v9 = vsel %vm68_vm0, %v72_v7, %v70_v6  ;;  %v79_v10 = vsel %vm68_vm0, %v69_v4, %v71_v5  ;;  %v80_v11 = vsel %vm68_vm0, %v70_v6, %v72_v7 }
  0x24   :  { %77 = vst [vmem:[#allocation7] sm:$0xff] %v75_v8  ;;  %78 = vst [vmem:[#allocation7 + $0x8] sm:$0xff] %v76_v9 }
  0x25   :  { %81 = vst [vmem:[#allocation8] sm:$0xff] %v79_v10  ;;  %82 = vst [vmem:[#allocation8 + $0x8] sm:$0xff] %v80_v11 }
  0x26   :  { %168 = shalt.err (!%p165_p0)
}
  0x27   :  { %92 = dma.vmem_to_hbm [thread:$0]  %s90_s0, 256, %s243_s2, [#allocation4]  }
  0x28   :  { %s177_s27 = scalar_lea.vmem %s100_s24, 256  ;;  %p182_p2 = scmp.lt.s32.totalorder %s100_s24, %s100_s24 }
  0x29   :  { %p178_p1 = scmp.ne.s32.totalorder %s100_s24, %s177_s27  ;;  %p183_p3 = scmp.lt.s32.totalorder %s177_s27, %s177_s27 }
  0x2b   :  { %p184_p4 = por %p183_p3, %p182_p2 }
  0x2d   :  { %p185_p5 = pnand %p184_p4, %p178_p1 }
  0x2f   :  { %188 = shalt.err (!%p185_p5)
}
  0x30   :  { %102 = dma.vmem_to_hbm [thread:$0]  %s100_s24, 256, %s244_s3, [#allocation9]  }
  0x31   :  { %201 = dma.done.wait [#allocation4], 256  }
  0x32   :  { %202 = vsyncadd [#allocation4], 4294967040 }
  0x33   :  { %203 = dma.done.wait [#allocation9], 256  }
  0x34   :  { %204 = vsyncadd [#allocation9], 4294967040 }
  0x35   :  { %109 = vsyncpa [#allocation3], 1 }
  0x36   :  { %110 = vsyncpa [#allocation6], 1 }
  0x37   :  { %111 = vsyncpa [#allocation4], 1 }
  0x38   :  { %112 = vsyncpa [#allocation9], 1 }

</bundles_post_ra>
